<compile_context>
chip_gen: v7x
topology: tpu7x:2x2x1
jax: 0.10.0
libtpu: 0.0.40
codegen_flags: <defaults>
</compile_context>

<pallas_src>
import functools

import jax
import jax.numpy as jnp
from jax.experimental import pallas as pl
from jax.experimental.pallas import tpu as pltpu


# ---------------------------------------------------------------------------
# Fused single-pass kernel (whole array resident in VMEM, grid=(1,)).
# ---------------------------------------------------------------------------
def _fused_kernel(z_ref, a_ref, b_ref, o_ref, *, n_elem, eps):
    z = z_ref[...].astype(jnp.float32)
    mu = jnp.sum(z) / n_elem
    d = z - mu
    # torch.std default is unbiased (N - 1). Guard N == 1 (torch yields NaN).
    var = jnp.sum(d * d) / max(n_elem - 1.0, 1.0)
    inv = 1.0 / (jnp.sqrt(jnp.maximum(var, 0.0)) + eps)
    scale = a_ref[...] * inv                      # (1, hidden)
    o_ref[...] = (d * scale + b_ref[...]).astype(o_ref.dtype)


# ---------------------------------------------------------------------------
# Pass 1: global sum / sum-of-squares via vector-shaped partial accumulators.
# Grid = (n_parts [parallel], steps_per_part [arbitrary]); each part owns its
# own resident (8, hidden) f32 output blocks (accumulators).
# ---------------------------------------------------------------------------
def _stats_kernel(z_ref, psum_ref, psq_ref, *, tm, hidden, n_rows,
                  steps_per_part, needs_mask):
    j = pl.program_id(1)

    @pl.when(j == 0)
    def _():
        psum_ref[...] = jnp.zeros_like(psum_ref)
        psq_ref[...] = jnp.zeros_like(psq_ref)

    tile = pl.program_id(0) * steps_per_part + j  # logical row-tile index

    def accumulate(zt):
        zsq = zt * zt
        if hidden % 128 == 0:
            # Fold rows into sublane groups; reduction over the leading axis
            # lowers to elementwise vreg adds (VALU), which have huge slack
            # while the next tile's DMA streams. No per-step XLU reductions.
            g = zt.reshape(tm // 8, 8, hidden)
            gsq = zsq.reshape(tm // 8, 8, hidden)
            psum_ref[...] += jnp.sum(g, axis=0)
            psq_ref[...] += jnp.sum(gsq, axis=0)
        else:
            # TODO(synk): lane-dense refold (fold rows into lanes) when the
            # hidden dim is not a multiple of 128.
            psum_ref[0:1, :] += jnp.sum(zt, axis=0, keepdims=True)
            psq_ref[0:1, :] += jnp.sum(zsq, axis=0, keepdims=True)

    z = z_ref[...].astype(jnp.float32)

    if needs_mask:
        # Only the ragged last tile needs the row mask; full tiles skip it.
        n_full = n_rows // tm

        @pl.when(tile < n_full)
        def _():
            accumulate(z)

        @pl.when(tile >= n_full)
        def _():
            row_ids = (jax.lax.broadcasted_iota(jnp.int32, (tm, 1), 0)
                       + tile * tm)
            accumulate(jnp.where(row_ids < n_rows, z, 0.0))
    else:
        accumulate(z)


# ---------------------------------------------------------------------------
# Pass 2: streaming affine  o = z * scale + bias  (scale/bias precomputed).
# Note: on a ragged last tile the out-of-range rows compute on stale VMEM,
# but the writeback is clipped to valid rows, so it is harmless.
# ---------------------------------------------------------------------------
def _affine_kernel(z_ref, scale_ref, bias_ref, o_ref):
    z = z_ref[...].astype(jnp.float32)
    o_ref[...] = (z * scale_ref[...] + bias_ref[...]).astype(o_ref.dtype)


def layer_norm_forward(z, a2, b2, *, eps=1e-5,
                       fused_limit_bytes=4 * 1024 * 1024,
                       tile_bytes=2 * 1024 * 1024):
    """Pallas equivalent of LayerNormalization.forward.

    z:  float array, last dim == hidden_size (any leading shape).
    a2: (1, hidden_size) scale.   b2: (1, hidden_size) shift.
    """
    hidden = a2.shape[-1]
    assert z.shape[-1] == hidden, (z.shape, hidden)
    orig_shape, orig_dtype = z.shape, z.dtype

    z2 = z.reshape(-1, hidden)
    n_rows = z2.shape[0]
    n_elem = n_rows * hidden

    a_f32 = a2.reshape(1, hidden).astype(jnp.float32)
    b_f32 = b2.reshape(1, hidden).astype(jnp.float32)

    # ---------------- Fast path: fused single pass ----------------
    if n_elem * 4 <= fused_limit_bytes:
        out = pl.pallas_call(
            functools.partial(_fused_kernel, n_elem=float(n_elem),
                              eps=float(eps)),
            out_shape=jax.ShapeDtypeStruct((n_rows, hidden), orig_dtype),
            grid_spec=pltpu.PrefetchScalarGridSpec(
                num_scalar_prefetch=0,
                grid=(1,),
                in_specs=[
                    pl.BlockSpec((n_rows, hidden), lambda i: (0, 0)),
                    pl.BlockSpec((1, hidden), lambda i: (0, 0)),
                    pl.BlockSpec((1, hidden), lambda i: (0, 0)),
                ],
                out_specs=pl.BlockSpec((n_rows, hidden), lambda i: (0, 0)),
            ),
            compiler_params=pltpu.CompilerParams(
                dimension_semantics=("arbitrary",),
                vmem_limit_bytes=32 * 1024 * 1024),
        )(z2, a_f32, b_f32)
        return out.reshape(orig_shape)

    # ---------------- Two-pass path for large arrays ----------------
    itemsize = jnp.dtype(z2.dtype).itemsize
    # Sublane alignment (16 rows for bf16 packing, 32 for int8/fp8).
    row_align = 8 if itemsize >= 4 else (16 if itemsize == 2 else 32)
    # ~2 MiB input tiles: amortizes the ~0.35 us/step pipeline overhead
    # (>=85% of HBM roofline) while keeping 2x in + 2x out double-buffered
    # tiles (~8 MiB) under every generation's scoped-VMEM default.
    tm = max(row_align,
             (tile_bytes // (hidden * itemsize)) // row_align * row_align)
    tm = min(tm, ((n_rows + row_align - 1) // row_align) * row_align)
    n_tiles = pl.cdiv(n_rows, tm)

    # Split the stats reduction into 2 independent "parallel" parts when the
    # tile count divides evenly -> both v7x TensorCores can work on pass 1.
    n_parts = 2 if (n_tiles >= 4 and n_tiles % 2 == 0) else 1
    steps_per_part = n_tiles // n_parts
    needs_mask = (n_rows % tm) != 0

    psum, psq = pl.pallas_call(
        functools.partial(_stats_kernel, tm=tm, hidden=hidden, n_rows=n_rows,
                          steps_per_part=steps_per_part,
                          needs_mask=needs_mask),
        out_shape=(
            jax.ShapeDtypeStruct((n_parts * 8, hidden), jnp.float32),
            jax.ShapeDtypeStruct((n_parts * 8, hidden), jnp.float32),
        ),
        grid_spec=pltpu.PrefetchScalarGridSpec(
            num_scalar_prefetch=0,
            grid=(n_parts, steps_per_part),
            in_specs=[pl.BlockSpec(
                (tm, hidden), lambda i, j: (i * steps_per_part + j, 0))],
            out_specs=(
                pl.BlockSpec((8, hidden), lambda i, j: (i, 0)),
                pl.BlockSpec((8, hidden), lambda i, j: (i, 0)),
            ),
        ),
        compiler_params=pltpu.CompilerParams(
            dimension_semantics=("parallel", "arbitrary")),
    )(z2)

    # Tiny final reduction + scale/bias folding in plain JAX (a few scalars).
    total = jnp.sum(psum)
    total_sq = jnp.sum(psq)
    n = float(n_elem)
    mu = total / n
    # E[x^2] - mu^2 with f32 vector partial accumulators; unbiased (N - 1).
    var = (total_sq - n * mu * mu) / float(max(n_elem - 1, 1))
    sigma = jnp.sqrt(jnp.maximum(var, 0.0))
    scale = a_f32 / (sigma + eps)                 # (1, hidden)
    bias = b_f32 - mu * scale                     # (1, hidden)

    out = pl.pallas_call(
        _affine_kernel,
        out_shape=jax.ShapeDtypeStruct((n_rows, hidden), orig_dtype),
        grid_spec=pltpu.PrefetchScalarGridSpec(
            num_scalar_prefetch=0,
            grid=(n_tiles,),
            in_specs=[
                pl.BlockSpec((tm, hidden), lambda i: (i, 0)),
                pl.BlockSpec((1, hidden), lambda i: (0, 0)),
                pl.BlockSpec((1, hidden), lambda i: (0, 0)),
            ],
            out_specs=pl.BlockSpec((tm, hidden), lambda i: (i, 0)),
        ),
        compiler_params=pltpu.CompilerParams(
            dimension_semantics=("parallel",)),
    )(z2, scale, bias)

    return out.reshape(orig_shape)


if __name__ == "__main__":
    hidden_size = 128
    eps = 1e-5

    key = jax.random.PRNGKey(0)
    kz1, kz2, kz3, ka, kb = jax.random.split(key, 5)
    # Module init is a2=ones, b2=zeros; random params exercise the affine path.
    a2 = jax.random.normal(ka, (1, hidden_size), dtype=jnp.float32)
    b2 = jax.random.normal(kb, (1, hidden_size), dtype=jnp.float32)

    def reference(z):
        mu = jnp.mean(z)
        sigma = jnp.std(z, ddof=1)     # torch.std: unbiased
        return (z - mu) / (sigma + eps) * a2 + b2

    def run_and_check(z, **kw):
        out = jax.block_until_ready(layer_norm_forward(z, a2, b2, eps=eps, **kw))
        ref = reference(z)
        assert out.shape == z.shape, out.shape
        assert out.dtype == z.dtype, out.dtype
        assert bool(jnp.allclose(out, ref, rtol=1e-4, atol=1e-4)), \
            "Pallas LayerNormalization mismatch vs reference"

    # 1) Fused single-pass path (small z, resident in VMEM).
    z = jax.random.normal(kz1, (2, 8, hidden_size), dtype=jnp.float32)
    run_and_check(z)

    # 2) Two-pass path with a ragged last row-tile (tiny tiles force 3 steps).
    z = jax.random.normal(kz2, (2, 9, hidden_size), dtype=jnp.float32)
    run_and_check(z, fused_limit_bytes=0, tile_bytes=4096)

    # 3) Two-pass path with the dual-part (megacore-friendly) stats split.
    z = jax.random.normal(kz3, (4, 8, hidden_size), dtype=jnp.float32)
    run_and_check(z, fused_limit_bytes=0, tile_bytes=4096)

    print("KERNEL_OK")
</pallas_src>

<mosaic_0001>
module attributes {stable_mosaic.version = 11 : i64} {
  func.func @_fused_kernel(%arg0: i32, %arg1: memref<16x128xf32, #tpu.memory_space<vmem>>, %arg2: memref<1x128xf32, #tpu.memory_space<vmem>>, %arg3: memref<1x128xf32, #tpu.memory_space<vmem>>, %arg4: memref<16x128xf32, #tpu.memory_space<vmem>>) attributes {dimension_semantics = [#tpu.dimension_semantics<arbitrary>], iteration_bounds = array<i64: 1>, scalar_prefetch = 0 : i64, scratch_operands = 0 : i64, tpu.core_type = #tpu.core_type<tc>, window_params = [{pipeline_mode = #tpu.pipeline_mode<synchronous>, transform_indices = @transform_0, window_bounds = array<i64: 16, 128>}, {pipeline_mode = #tpu.pipeline_mode<synchronous>, transform_indices = @transform_1, window_bounds = array<i64: 1, 128>}, {pipeline_mode = #tpu.pipeline_mode<synchronous>, transform_indices = @transform_2, window_bounds = array<i64: 1, 128>}, {pipeline_mode = #tpu.pipeline_mode<synchronous>, transform_indices = @transform_3, window_bounds = array<i64: 16, 128>}]} {
    %c0 = arith.constant 0 : index
    %c0_0 = arith.constant 0 : index
    %0 = vector.load %arg1[%c0, %c0_0] : memref<16x128xf32, #tpu.memory_space<vmem>>, vector<16x128xf32>
    %1 = vector.shape_cast %0 : vector<16x128xf32> to vector<1x16x128xf32>
    %cst = arith.constant dense<0.000000e+00> : vector<1xf32>
    %2 = vector.multi_reduction <add>, %1, %cst [1, 2] : vector<1x16x128xf32> to vector<1xf32>
    %3 = vector.shape_cast %2 : vector<1xf32> to vector<1x1x1xf32>
    %4 = vector.extract %3[0, 0, 0] : f32 from vector<1x1x1xf32>
    %cst_1 = arith.constant 2.048000e+03 : f32
    %5 = arith.divf %4, %cst_1 : f32
    %6 = vector.broadcast %5 : f32 to vector<16x128xf32>
    %7 = arith.subf %0, %6 : vector<16x128xf32>
    %8 = arith.mulf %7, %7 : vector<16x128xf32>
    %9 = vector.shape_cast %8 : vector<16x128xf32> to vector<1x16x128xf32>
    %cst_2 = arith.constant dense<0.000000e+00> : vector<1xf32>
    %10 = vector.multi_reduction <add>, %9, %cst_2 [1, 2] : vector<1x16x128xf32> to vector<1xf32>
    %11 = vector.shape_cast %10 : vector<1xf32> to vector<1x1x1xf32>
    %12 = vector.extract %11[0, 0, 0] : f32 from vector<1x1x1xf32>
    %cst_3 = arith.constant 2.047000e+03 : f32
    %13 = arith.divf %12, %cst_3 : f32
    %cst_4 = arith.constant 0.000000e+00 : f32
    %14 = arith.maximumf %13, %cst_4 : f32
    %15 = math.sqrt %14 : f32
    %cst_5 = arith.constant 9.99999974E-6 : f32
    %16 = arith.addf %15, %cst_5 : f32
    %cst_6 = arith.constant 1.000000e+00 : f32
    %17 = arith.divf %cst_6, %16 : f32
    %c0_7 = arith.constant 0 : index
    %c0_8 = arith.constant 0 : index
    %18 = vector.load %arg2[%c0_7, %c0_8] : memref<1x128xf32, #tpu.memory_space<vmem>>, vector<1x128xf32>
    %19 = vector.broadcast %17 : f32 to vector<1x128xf32>
    %20 = arith.mulf %18, %19 : vector<1x128xf32>
    %21 = vector.broadcast %20 : vector<1x128xf32> to vector<16x128xf32>
    %22 = arith.mulf %7, %21 : vector<16x128xf32>
    %c0_9 = arith.constant 0 : index
    %c0_10 = arith.constant 0 : index
    %23 = vector.load %arg3[%c0_9, %c0_10] : memref<1x128xf32, #tpu.memory_space<vmem>>, vector<1x128xf32>
    %24 = vector.broadcast %23 : vector<1x128xf32> to vector<16x128xf32>
    %25 = arith.addf %22, %24 : vector<16x128xf32>
    %c0_11 = arith.constant 0 : index
    %c0_12 = arith.constant 0 : index
    %26 = vector.load %arg4[%c0_11, %c0_12] : memref<16x128xf32, #tpu.memory_space<vmem>>, vector<16x128xf32>
    tpu.vector_store %arg4[%c0_11, %c0_12], %25 {strides = array<i32>} : memref<16x128xf32, #tpu.memory_space<vmem>>, vector<16x128xf32>,
    return
  }
  func.func @transform_0(%arg0: i32) -> (i32, i32) {
    %c0_i32 = arith.constant 0 : i32
    %c0_i32_0 = arith.constant 0 : i32
    %c0_i32_1 = arith.constant 0 : i32
    return %c0_i32, %c0_i32_0 : i32, i32
  }
  func.func @transform_1(%arg0: i32) -> (i32, i32) {
    %c0_i32 = arith.constant 0 : i32
    %c0_i32_0 = arith.constant 0 : i32
    %c0_i32_1 = arith.constant 0 : i32
    return %c0_i32, %c0_i32_0 : i32, i32
  }
  func.func @transform_2(%arg0: i32) -> (i32, i32) {
    %c0_i32 = arith.constant 0 : i32
    %c0_i32_0 = arith.constant 0 : i32
    %c0_i32_1 = arith.constant 0 : i32
    return %c0_i32, %c0_i32_0 : i32, i32
  }
  func.func @transform_3(%arg0: i32) -> (i32, i32) {
    %c0_i32 = arith.constant 0 : i32
    %c0_i32_0 = arith.constant 0 : i32
    %c0_i32_1 = arith.constant 0 : i32
    return %c0_i32, %c0_i32_0 : i32, i32
  }
}

</mosaic_0001>

<bundles_post_ra>
// kernel: tpu_custom_call.1
= control target key start
LH: loop header
LB: loop body
LE: loop exit
PB: predicated region body
PF: predicated region fallthrough
CT: control target
= control target key end

     0   :  { %8 = vsyncpa [#allocation3], 0  ;;  %s242_s0 = inlined_call_operand.hbm [shape: f32[16,128], index: 0, kind: input, shape index: {}]   ;;  %s243_s1 = inlined_call_operand.vmem [shape: f32[1,128], index: 1, kind: input, shape index: {}]   ;;  %s244_s2 = inlined_call_operand.vmem [shape: f32[1,128], index: 2, kind: input, shape index: {}]   ;;  %s245_s3 = inlined_call_operand.hbm [shape: f32[16,128], index: 3, kind: output, shape index: {}]  }
   0x1   :  { %9 = vsyncpa [#allocation4], 0  ;;  %s181_s12 = smov [#allocation2]   ;;  %s133_s16 = scalar_lea.hbm %s242_s0, 256 }
   0x2   :  { %s15_s13 = sshll.u32 %s181_s12, 4  ;;  %p134_p0 = scmp.ne.s32.totalorder %s242_s0, %s133_s16  ;;  %s16_s13 = int_to_ptr.vmem [resolvable:$true] %s15_s13 }
   0x3   :  { %p137_p1 = scmp.lt.u32.totalorder %s133_s16, %s242_s0 }
   0x5   :  { %p139_p2 = pnand %p137_p1, %p134_p0 }
   0x7   :  { %142 = shalt.err (!%p139_p2)
}
   0x8   :  { %s143_s21 = scalar_lea.vmem %s16_s13, 256  ;;  %p148_p4 = scmp.lt.s32.totalorder %s16_s13, %s16_s13 }
   0x9   :  { %p144_p3 = scmp.ne.s32.totalorder %s16_s13, %s143_s21  ;;  %p149_p5 = scmp.lt.s32.totalorder %s143_s21, %s143_s21 }
   0xb   :  { %p150_p6 = por %p149_p5, %p148_p4 }
   0xd   :  { %p151_p7 = pnand %p150_p6, %p144_p3 }
   0xf   :  { %154 = shalt.err (!%p151_p7)
}
  0x10   :  { %s182_s22 = smov 128   ;;  %s183_s23 = smov 8  }
  0x11   :  { %21 = dma.hbm_to_vmem [thread:$0]  %s242_s0, 256, %s16_s13, [#allocation3], %s182_s22, %s182_s22, %s183_s23  }
  0x12   :  { %177 = dma.done.wait [#allocation3], 256  }
  0x13   :  { %178 = vsyncadd [#allocation3], 4294967040  ;;  %v29_v0 = vld [vmem:[#allocation2] sm:$0xff]  ;;  %v30_v1 = vld [vmem:[#allocation2 + $0x8] sm:$0xff]  ;;  %s184_s29 = smov 0.0   ;;  %v80_v31 = vlaneseq  ;;  %s185_s11 = smov [#allocation5]  }
  0x14   :  { %v31_v2 = vadd.f32 %v30_v1, %v29_v0  ;;  %v76_v33 = vld [vmem:[%s243_s1] sm:$0x1]  ;;  %s103_s12 = sshll.u32 %s185_s11, 4  ;;  %s104_s12 = int_to_ptr.vmem [resolvable:$true] %s103_s12 }
  0x15   :  { %v81_v32 = vshrl.u32 %v80_v31, 7  ;;  %v115_v38 = vld [vmem:[%s244_s2] ss:$0 sm:$0xff]  ;;  %s155_s13 = scalar_lea.vmem %s104_s12, 256  ;;  %p160_p9 = scmp.lt.s32.totalorder %s104_s12, %s104_s12 }
  0x16   :  { %32 = vadd.xlane.f32.xlu0 %v31_v2  ;;  %p156_p8 = scmp.ne.s32.totalorder %s104_s12, %s155_s13  ;;  %p161_p10 = scmp.lt.s32.totalorder %s155_s13, %s155_s13 }
  0x17   :  { %v82_v34 = vsub.s32 0, %v81_v32 }
  0x18   :  { %p162_p11 = por %p161_p10, %p160_p9 }
  0x1a   :  { %p163_p12 = pnand %p162_p11, %p156_p8 }
  0xa3   :  { %v33_v3 = vpop.xlane.xlu0 %32 }
  0xa4   :  { %v34_v4 = vrot.slane %v33_v3, 4 }
  0xa6   :  { %v35_v5 = vadd.f32 %v34_v4, %v33_v3 }
  0xa8   :  { %v36_v6 = vrot.slane %v35_v5, 2 }
  0xaa   :  { %v37_v7 = vadd.f32 %v36_v6, %v35_v5 }
  0xac   :  { %v38_v8 = vrot.slane %v37_v7, 1 }
  0xae   :  { %v39_v9 = vadd.f32 %v38_v8, %v37_v7 }
  0xb0   :  { %116 = vpush %v39_v9 }
  0xe1   :  { %s117_s26 = spop %116 }
  0xe2   :  { %s43_s27 = smul.f32 0.00048828125, %s117_s26 }
  0xe4   :  { %v44_v10 = vstv %s43_s27 }
  0xe5   :  { %v45_v11 = vsub.f32 %v29_v0, %v44_v10  ;;  %v46_v12 = vsub.f32 %v30_v1, %v44_v10 }
  0xe7   :  { %v47_v13 = vmul.f32 %v45_v11, %v45_v11  ;;  %v48_v14 = vmul.f32 %v46_v12, %v46_v12 }
  0xe9   :  { %v49_v15 = vadd.f32 %v48_v14, %v47_v13 }
  0xeb   :  { %50 = vadd.xlane.f32.xlu0 %v49_v15 }
 0x178   :  { %v51_v16 = vpop.xlane.xlu0 %50 }
 0x179   :  { %v52_v17 = vrot.slane %v51_v16, 4 }
 0x17b   :  { %v53_v18 = vadd.f32 %v52_v17, %v51_v16 }
 0x17d   :  { %v54_v19 = vrot.slane %v53_v18, 2 }
 0x17f   :  { %v55_v20 = vadd.f32 %v54_v19, %v53_v18 }
 0x181   :  { %v56_v21 = vrot.slane %v55_v20, 1 }
 0x183   :  { %v57_v22 = vadd.f32 %v56_v21, %v55_v20 }
 0x185   :  { %118 = vpush %v57_v22 }
 0x1b6   :  { %s119_s0 = spop %118 }
 0x1b7   :  { %s61_s28 = smul.f32 0.0004885198, %s119_s0 }
 0x1b9   :  { %s62_s30 = smax.f32 %s184_s29, %s61_s28 }
 0x1ba   :  { %v63_v23 = vstv %s62_s30 }
 0x1bb   :  { %129 = vrsqrt.f32 %v63_v23  ;;  %vm66_vm0 = vcmp.eq.f32.partialorder %v63_v23, inf  ;;  %v69_v26 = vand.u32 2147483648, %v63_v23  ;;  %vm68_vm1 = vcmp.eq.f32.partialorder %v63_v23, 0.0 }
 0x1c5   :  { %v130_v24 = vpop.eup %129 }
 0x1c6   :  { %v65_v25 = vmul.f32 %v130_v24, %v63_v23 }
 0x1c8   :  { %v67_v27 = vsel %vm66_vm0, %v63_v23, %v65_v25 }
 0x1c9   :  { %v70_v28 = vsel %vm68_vm1, %v69_v26, %v67_v27 }
 0x1ca   :  { %120 = vpush %v70_v28 }
 0x1fb   :  { %s121_s4 = spop %120 }
 0x1fc   :  { %s72_s5 = sadd.f32 1e-05, %s121_s4 }
 0x1fe   :  { %v73_v29 = vstv %s72_s5 }
 0x1ff   :  { %131 = vrcp.f32 %v73_v29 }
 0x209   :  { %v132_v30 = vpop.eup %131 }
 0x20a   :  { %122 = vpush %v132_v30 }
 0x23b   :  { %s123_s8 = spop %122 }
 0x23c   :  { %v77_v35 = vstv %s123_s8 }
 0x23d   :  { %v78_v36 = vmul.f32 %v77_v35, %v76_v33 }
 0x23f   :  { %v83_v37 = vrot.slane %v78_v36, %v82_v34 }
 0x241   :  { %v85_v39 = vmul.f32 %v83_v37, %v45_v11  ;;  %v86_v40 = vmul.f32 %v83_v37, %v46_v12 }
 0x243   :  { %v94_v41 = vadd.f32 %v115_v38, %v85_v39  ;;  %v95_v42 = vadd.f32 %v115_v38, %v86_v40 }
 0x245   :  { %96 = vst [vmem:[#allocation5] sm:$0xff] %v94_v41  ;;  %97 = vst [vmem:[#allocation5 + $0x8] sm:$0xff] %v95_v42 }
 0x246   :  { %166 = shalt.err (!%p163_p12)
}
 0x247   :  { %s167_s2 = scalar_lea.hbm %s245_s3, 256 }
 0x248   :  { %p168_p13 = scmp.ne.s32.totalorder %s245_s3, %s167_s2  ;;  %p171_p0 = scmp.lt.u32.totalorder %s167_s2, %s245_s3 }
 0x24a   :  { %p173_p1 = pnand %p171_p0, %p168_p13 }
 0x24c   :  { %176 = shalt.err (!%p173_p1)
}
 0x24d   :  { %109 = dma.vmem_to_hbm [thread:$0]  %s104_s12, 256, %s245_s3, [#allocation4], %s182_s22, %s182_s22, %s183_s23  }
 0x24e   :  { %179 = dma.done.wait [#allocation4], 256  }
 0x24f   :  { %180 = vsyncadd [#allocation4], 4294967040 }
 0x250   :  { %113 = vsyncpa [#allocation3], 1 }
 0x251   :  { %114 = vsyncpa [#allocation4], 1 }

</bundles_post_ra>
